<compile_context>
chip_gen: v7x
topology: tpu7x:2x2x1
jax: 0.10.0
libtpu: 0.0.40
codegen_flags: <defaults>
</compile_context>

<pallas_src>
import numpy as np
import jax
import jax.numpy as jnp
from jax.experimental import pallas as pl
from jax.experimental.pallas import tpu as pltpu

B, CIN, COUT, H, W, K = 2, 3, 8, 8, 8, 3
KKC = K * K * CIN          # 27  (conv contraction depth)
KPAD = 32                  # 27 conv rows + 2 fused-bias rows + 3 zero rows
NHW = B * H * W            # 128 (lane dimension — exactly one vreg width)


def model_kernel(w_ref, p_ref, o_ref):
    # w_ref : (COUT, KPAD)  VMEM  [-W flat | other-conv_b | 1 | 0 0 0]
    # p_ref : (KPAD, NHW)   VMEM  [im2col patches | ones | hw_bias | zeros]
    # o_ref : (COUT, NHW)   VMEM  lane-dense output tile (one (8,128) vreg)
    acc = jax.lax.dot_general(
        w_ref[...], p_ref[...],
        dimension_numbers=(((1,), (0,)), ((), ())),
        preferred_element_type=jnp.float32)          # (8, 128)
    o_ref[...] = jnp.maximum(acc, 0.0)               # ReLU; single unmasked vst


def run_model(x_nchw, conv_w_oihw, conv_b, other_scalar, hw_bias):
    assert x_nchw.shape == (B, CIN, H, W), "layout hard-codes B*H*W == 128 lanes"
    x = x_nchw.astype(jnp.float32)
    xpad = jnp.pad(x, ((0, 0), (0, 0), (1, 1), (1, 1)))      # (B,CIN,H+2,W+2)

    # ---- im2col: patches[i*9 + kh*3 + kw, b*H*W + h*W + w] = xpad[b,i,h+kh,w+kw]
    cols = [xpad[:, :, kh:kh + H, kw:kw + W]                  # (B,CIN,H,W)
            for kh in range(K) for kw in range(K)]
    patches = jnp.stack(cols, axis=2)                         # (B,CIN,9,H,W)
    patches = patches.reshape(B, KKC, H * W)                  # i*9 + kh*3 + kw
    patches = jnp.transpose(patches, (1, 0, 2)).reshape(KKC, NHW)  # batch-major lanes

    # ---- fold the rank-2 bias into the contraction, then pad K to 32 -------
    hw_flat = jnp.asarray(hw_bias, jnp.float32).reshape(1, H * W)
    hw_row = jnp.tile(hw_flat, (1, B))                        # (1, NHW), batch-major
    ones_row = jnp.ones((1, NHW), jnp.float32)
    zero_rows = jnp.zeros((KPAD - KKC - 2, NHW), jnp.float32)
    patches_ext = jnp.concatenate(
        [patches, ones_row, hw_row, zero_rows], axis=0)       # (32, 128)

    w_neg = -conv_w_oihw.astype(jnp.float32).reshape(COUT, KKC)   # same 27-ordering
    col_bias = (jnp.float32(other_scalar)
                - jnp.asarray(conv_b, jnp.float32)).reshape(COUT, 1)
    col_one = jnp.ones((COUT, 1), jnp.float32)
    col_zero = jnp.zeros((COUT, KPAD - KKC - 2), jnp.float32)
    w_ext = jnp.concatenate([w_neg, col_bias, col_one, col_zero], axis=1)  # (8, 32)

    cost = pl.CostEstimate(
        flops=2 * COUT * KPAD * NHW,
        transcendentals=0,
        bytes_accessed=4 * (COUT * KPAD + KPAD * NHW + COUT * NHW))

    out_flat = pl.pallas_call(
        model_kernel,
        out_shape=jax.ShapeDtypeStruct((COUT, NHW), jnp.float32),
        in_specs=[
            pl.BlockSpec(memory_space=pltpu.MemorySpace.VMEM),   # w_ext
            pl.BlockSpec(memory_space=pltpu.MemorySpace.VMEM),   # patches_ext
        ],
        out_specs=pl.BlockSpec(memory_space=pltpu.MemorySpace.VMEM),
        cost_estimate=cost,
    )(w_ext, patches_ext)

    # (COUT, B*H*W) -> (B, COUT, H, W)  -- one tiny (4 KB) transpose
    return jnp.transpose(out_flat.reshape(COUT, B, H, W), (1, 0, 2, 3))


def reference(x_nchw, conv_w_oihw, conv_b, other_scalar, hw_bias):
    conv = jax.lax.conv_general_dilated(
        x_nchw.astype(jnp.float32), conv_w_oihw.astype(jnp.float32),
        window_strides=(1, 1), padding=((1, 1), (1, 1)),
        dimension_numbers=("NCHW", "OIHW", "NCHW"))
    conv = conv + conv_b.reshape(1, COUT, 1, 1)
    v5 = other_scalar - conv + hw_bias.reshape(1, 1, H, W)
    return jnp.maximum(v5, 0.0)


if __name__ == "__main__":
    key = jax.random.PRNGKey(0)
    kx, kw, kb = jax.random.split(key, 3)

    # Input (PyTorch NCHW): (2, 3, 8, 8) so the (1,1,8,8) bias broadcasts.
    x = jax.random.normal(kx, (B, CIN, H, W), dtype=jnp.float32)

    # Conv2d(3, 8, 3) parameters, PyTorch-style uniform(-k, k), k=1/sqrt(fan_in).
    fan_in = CIN * K * K
    bound = 1.0 / np.sqrt(fan_in)
    conv_w = jax.random.uniform(kw, (COUT, CIN, K, K), jnp.float32, -bound, bound)
    conv_b = jax.random.uniform(kb, (COUT,), jnp.float32, -bound, bound)

    # "other" parameter: original reshape(1,1,1,1) of a 4-element array is
    # invalid; use its first value as the intended scalar.
    other_scalar = jnp.float32(-0.12918424)

    # TODO(synk): original v4 numpy expression is malformed (float-indexed
    # list); reconstruct a deterministic (1,1,8,8) bias from the listed 8x4
    # values tiled to 8x8.
    v4_rows = np.array([
        [-1.027756, -0.002286639, -0.001510427, -0.0009867046],
        [-0.004274235, -0.01359701, -0.01104885, -0.00629437],
        [-9.07233e-08, 7.456594e-08, 0.01389359, 0.002382906],
        [3.021077e-07, -2.305938e-07, 0.006808552, 0.0007897332],
        [0.00581536, 0.01292148, 0.233848, 0.8578209],
        [0.01520595, 0.003752044, 0.0007897332, 0.1060929],
        [-0.01104885, -0.006238518, -0.01636302, -0.005617751],
        [-0.004738528, -0.009018803, -0.2910816, -0.6505371],
    ], dtype=np.float32)
    hw_bias = jnp.asarray(np.concatenate([v4_rows, v4_rows], axis=1))  # (8, 8)

    out = run_model(x, conv_w, conv_b, other_scalar, hw_bias)
    out = jax.block_until_ready(out)

    ref = reference(x, conv_w, conv_b, other_scalar, hw_bias)
    np.testing.assert_allclose(np.asarray(out), np.asarray(ref),
                               rtol=1e-5, atol=1e-5)
    assert out.shape == (B, COUT, H, W)
    print("KERNEL_OK")
</pallas_src>

<mosaic_0001>
module attributes {stable_mosaic.version = 11 : i64} {
  func.func @model_kernel(%arg0: memref<8x32xf32, #tpu.memory_space<vmem>>, %arg1: memref<32x128xf32, #tpu.memory_space<vmem>>, %arg2: memref<8x128xf32, #tpu.memory_space<vmem>>) attributes {dimension_semantics = [], scalar_prefetch = 0 : i64, scratch_operands = 0 : i64, tpu.core_type = #tpu.core_type<tc>} {
    %c0 = arith.constant 0 : index
    %c0_0 = arith.constant 0 : index
    %0 = vector.load %arg0[%c0, %c0_0] : memref<8x32xf32, #tpu.memory_space<vmem>>, vector<8x32xf32>
    %c0_1 = arith.constant 0 : index
    %c0_2 = arith.constant 0 : index
    %1 = vector.load %arg1[%c0_1, %c0_2] : memref<32x128xf32, #tpu.memory_space<vmem>>, vector<32x128xf32>
    %cst = arith.constant dense<0.000000e+00> : vector<8x128xf32>
    %2 = tpu.matmul %0, %1, %cst {dimension_numbers = #tpu.dot_dimension_numbers<[1], [0], [0], [1], [0, 0, 1, 1], [], []>} : vector<8x32xf32>, vector<32x128xf32>, vector<8x128xf32> -> vector<8x128xf32>
    %cst_3 = arith.constant 0.000000e+00 : f32
    %3 = vector.broadcast %cst_3 : f32 to vector<8x128xf32>
    %4 = arith.maximumf %2, %3 : vector<8x128xf32>
    %c0_4 = arith.constant 0 : index
    %c0_5 = arith.constant 0 : index
    %5 = vector.load %arg2[%c0_4, %c0_5] : memref<8x128xf32, #tpu.memory_space<vmem>>, vector<8x128xf32>
    tpu.vector_store %arg2[%c0_4, %c0_5], %4 {strides = array<i32>} : memref<8x128xf32, #tpu.memory_space<vmem>>, vector<8x128xf32>,
    return
  }
}

</mosaic_0001>

<bundles_post_ra>
// kernel: tpu_custom_call.1
= control target key start
LH: loop header
LB: loop body
LE: loop exit
PB: predicated region body
PF: predicated region fallthrough
CT: control target
= control target key end

     0   :  { %7 = vsyncpa [#allocation3], 0  ;;  %s304_s0 = inlined_call_operand.hbm [shape: f32[8,32], index: 0, kind: input, shape index: {}]   ;;  %s305_s1 = inlined_call_operand.hbm [shape: f32[32,128], index: 1, kind: input, shape index: {}]   ;;  %s306_s2 = inlined_call_operand.hbm [shape: f32[8,128], index: 2, kind: output, shape index: {}]  }
   0x1   :  { %8 = vsyncpa [#allocation6], 0 }
   0x2   :  { %9 = vsyncpa [#allocation4], 0  ;;  %s238_s9 = smov [#allocation2]   ;;  %s239_s11 = smov [#allocation5]  }
   0x3   :  { %s16_s10 = sshll.u32 %s238_s9, 4  ;;  %s25_s12 = sshll.u32 %s239_s11, 4  ;;  %s17_s10 = int_to_ptr.vmem [resolvable:$true] %s16_s10  ;;  %s261_s12 = int_to_ptr.vmem [resolvable:$true] %s25_s12 }
   0x4   :  { %s166_s15 = scalar_lea.hbm %s304_s0, 128 }
   0x5   :  { %p167_p0 = scmp.ne.s32.totalorder %s304_s0, %s166_s15  ;;  %p170_p1 = scmp.lt.u32.totalorder %s166_s15, %s304_s0 }
   0x7   :  { %p172_p2 = pnand %p170_p1, %p167_p0 }
   0x9   :  { %175 = shalt.err (!%p172_p2)
}
   0xa   :  { %s176_s20 = scalar_lea.vmem %s17_s10, 128  ;;  %p181_p4 = scmp.lt.s32.totalorder %s17_s10, %s17_s10 }
   0xb   :  { %p177_p3 = scmp.ne.s32.totalorder %s17_s10, %s176_s20  ;;  %p182_p5 = scmp.lt.s32.totalorder %s176_s20, %s176_s20 }
   0xd   :  { %p183_p6 = por %p182_p5, %p181_p4 }
   0xf   :  { %p184_p7 = pnand %p183_p6, %p177_p3 }
  0x11   :  { %187 = shalt.err (!%p184_p7)
}
  0x12   :  { %19 = dma.hbm_to_vmem [thread:$0]  %s304_s0, 128, %s17_s10, [#allocation3]  }
  0x13   :  { %s188_s25 = scalar_lea.hbm %s305_s1, 512 }
  0x14   :  { %p189_p8 = scmp.ne.s32.totalorder %s305_s1, %s188_s25  ;;  %p192_p9 = scmp.lt.u32.totalorder %s188_s25, %s305_s1 }
  0x16   :  { %p194_p10 = pnand %p192_p9, %p189_p8 }
  0x18   :  { %197 = shalt.err (!%p194_p10)
}
  0x19   :  { %s198_s30 = scalar_lea.vmem %s261_s12, 512  ;;  %p203_p12 = scmp.lt.s32.totalorder %s261_s12, %s261_s12 }
  0x1a   :  { %p199_p11 = scmp.ne.s32.totalorder %s261_s12, %s198_s30  ;;  %p204_p13 = scmp.lt.s32.totalorder %s198_s30, %s198_s30 }
  0x1c   :  { %p205_p0 = por %p204_p13, %p203_p12 }
  0x1e   :  { %p206_p1 = pnand %p205_p0, %p199_p11 }
  0x20   :  { %209 = shalt.err (!%p206_p1)
}
  0x21   :  { %s240_s0 = smov 128   ;;  %s241_s3 = smov 8  }
  0x22   :  { %31 = dma.hbm_to_vmem [thread:$0]  %s305_s1, 512, %s261_s12, [#allocation6], %s240_s0, %s240_s0, %s241_s3  }
  0x23   :  { %232 = dma.done.wait [#allocation3], 128  }
  0x24   :  { %233 = vsyncadd [#allocation3], 4294967168 }
  0x25   :  { %234 = dma.done.wait [#allocation6], 512  }
  0x26   :  { %235 = vsyncadd [#allocation6], 4294966784  ;;  %v242_v0 = vmov 0.0|0.0   ;;  %vm243_vm0 = vmmov 0   ;;  %v244_v1 = vmov 0.0   ;;  %v39_v2 = vld [vmem:[#allocation5] sm:$0xff] }
  0x27   :  { %152 = vmatprep.subr.bf16.mxu0 %v242_v0  ;;  %149 = vmatprep.mubr.msk.f32.mxu0 %vm243_vm0, %v244_v1  ;;  %v40_v3 = vld [vmem:[#allocation5 + $0x8] sm:$0xff]  ;;  %v41_v4 = vld [vmem:[#allocation5 + $0x10] sm:$0xff]  ;;  %v42_v6 = vld [vmem:[#allocation5 + $0x18] sm:$0xff]  ;;  %vm43_vm1 = vcmask 261120   ;;  %s245_s1 = smov [#allocation7]  }
  0x28   :  { %v153_v5 = vpack.c.bf16 %v40_v3, %v39_v2  ;;  %v156_v7 = vpack.c.bf16 %v42_v6, %v41_v4  ;;  %v38_v8 = vld [vmem:[#allocation2] sm:$0xff]  ;;  %s125_s6 = sshll.u32 %s245_s1, 4  ;;  %s126_s6 = int_to_ptr.vmem [resolvable:$true] %s125_s6 }
  0x29   :  { %s210_s7 = scalar_lea.vmem %s126_s6, 128  ;;  %p215_p3 = scmp.lt.s32.totalorder %s126_s6, %s126_s6 }
  0x2a   :  { %154 = vmatpush3.bf16.msra.mxu0 %v153_v5  ;;  %p211_p2 = scmp.ne.s32.totalorder %s126_s6, %s210_s7  ;;  %p216_p4 = scmp.lt.s32.totalorder %s210_s7, %s210_s7 }
  0x2b   :  { %155 = vmatprep.subr.bf16.mxu0 %v242_v0 }
  0x2c   :  { %p217_p5 = por %p216_p4, %p215_p3 }
  0x2e   :  { %157 = vmatpush3.bf16.msra.mxu0 %v156_v7  ;;  %p218_p6 = pnand %p217_p5, %p211_p2 }
  0x31   :  { %150 = vmatmul.mubr.msk.f32.vlgmr.msra.gmra.mrb[0].mxu0 %vm43_vm1, %v38_v8 }
 0x104   :  { %v113_v9 = vpop.f32.mrb[0].mxu0 }
 0x105   :  { %v117_v10 = vmax.f32 %v113_v9, 0.0  ;;  %v151_v11 = vpop.f32.mrb[1].mxu0 }
 0x107   :  { %118 = vst [vmem:[#allocation7] sm:$0xff] %v117_v10 }
 0x108   :  { %221 = shalt.err (!%p218_p6)
}
 0x109   :  { %s222_s10 = scalar_lea.hbm %s306_s2, 128 }
 0x10a   :  { %p223_p7 = scmp.ne.s32.totalorder %s306_s2, %s222_s10  ;;  %p226_p8 = scmp.lt.u32.totalorder %s222_s10, %s306_s2 }
 0x10c   :  { %p228_p9 = pnand %p226_p8, %p223_p7 }
 0x10e   :  { %231 = shalt.err (!%p228_p9)
}
 0x10f   :  { %128 = dma.vmem_to_hbm [thread:$0]  %s126_s6, 128, %s306_s2, [#allocation4]  }
 0x110   :  { %236 = dma.done.wait [#allocation4], 128  }
 0x111   :  { %237 = vsyncadd [#allocation4], 4294967168 }
 0x112   :  { %132 = vsyncpa [#allocation3], 1 }
 0x113   :  { %133 = vsyncpa [#allocation6], 1 }
 0x114   :  { %134 = vsyncpa [#allocation4], 1 }

</bundles_post_ra>
